<compile_context>
chip_gen: v7x
topology: tpu7x:2x2x1
jax: 0.10.0
libtpu: 0.0.40
codegen_flags: <defaults>
</compile_context>

<pallas_src>
import jax
import jax.numpy as jnp
import numpy as np
from jax.experimental import pallas as pl
from jax.experimental.pallas import tpu as pltpu


def _make_kernel(stride, Cin_p, C1_p, Co_p, Ho, Wo, B_blk, has_down):
    """Fused ResBlock kernel for a block of B_blk batch elements."""
    L = Ho * Wo

    # ---- compile-time tap tables (group, lane-shift, W-boundary mask) ------
    # x_prep rows: group g holds Cin_p channels; lanes: H-padded (2 rows top /
    # 2 bottom) flattened spatial, so H boundaries read zeros automatically and
    # only W boundaries need masking.
    taps1 = []
    for kh in range(3):
        for kw in range(3):
            if stride == 1:
                g, s = 0, (kh + 1) * Wo + (kw - 1)
                m = 'l' if kw == 0 else ('r' if kw == 2 else None)
            else:  # stride 2: phased input, phase (a,b), shift (dh,dw) in {-1,0}
                a, dh = (1, -1) if kh == 0 else ((0, 0) if kh == 1 else (1, 0))
                b, dw = (1, -1) if kw == 0 else ((0, 0) if kw == 1 else (1, 0))
                g, s = a * 2 + b, (dh + 2) * Wo + dw
                m = 'l' if dw == -1 else None
            taps1.append((g, s, m))
    taps2 = [((kh + 1) * Wo + (kw - 1),
              'l' if kw == 0 else ('r' if kw == 2 else None))
             for kh in range(3) for kw in range(3)]

    def kernel(x_ref, w1_ref, w2_ref, c_ref, lm_ref, rm_ref, *rest):
        if has_down:
            wd_ref, o_ref = rest
        else:
            (o_ref,) = rest

        lm = lm_ref[...]                       # (1, L) bf16: zero where w == 0
        rm = rm_ref[...]                       # (1, L) bf16: zero where w == Wo-1
        c = c_ref[...]                         # (Cmax_p, 8) folded scales/biases
        w1 = w1_ref[...]                       # (C1_p, 9*Cin_p) bf16
        w2 = w2_ref[...]                       # (Co_p, 9*C1_p) bf16
        zpad = jnp.zeros((C1_p, 2 * Wo), jnp.bfloat16)   # hoisted out of the loop

        for b in range(B_blk):                 # static unroll over batch block
            xb = x_ref[b]                      # (G*Cin_p, (Ho+4)*Wo) bf16

            # ---- conv1: im2col = 9 lane-shift slices stacked on sublanes ----
            t1 = []
            for (g, s, m) in taps1:
                tp = xb[g * Cin_p:(g + 1) * Cin_p, s:s + L]
                if m == 'l':
                    tp = tp * lm
                elif m == 'r':
                    tp = tp * rm
                t1.append(tp)
            im1 = jnp.concatenate(t1, axis=0)                     # (9*Cin_p, L)
            acc1 = jnp.dot(w1, im1, preferred_element_type=jnp.float32)
            # bn1 (folded) * mask1, relu
            mid = jnp.maximum(acc1 * c[0:C1_p, 0:1] + c[0:C1_p, 1:2], 0.0)
            mid = mid.astype(jnp.bfloat16)                        # (C1_p, L)

            # ---- conv2 (stride 1): H-pad mid along the lane axis, same scheme
            mid_p = jnp.concatenate([zpad, mid, zpad], axis=1)
            t2 = []
            for (s, m) in taps2:
                tp = mid_p[:, s:s + L]
                if m == 'l':
                    tp = tp * lm
                elif m == 'r':
                    tp = tp * rm
                t2.append(tp)
            im2 = jnp.concatenate(t2, axis=0)                     # (9*C1_p, L)
            acc2 = jnp.dot(w2, im2, preferred_element_type=jnp.float32)
            out = acc2 * c[0:Co_p, 2:3] + c[0:Co_p, 3:4]          # bn2*mask2 folded

            # ---- residual: phase(0,0)/unpadded slice of x, f32 elementwise ----
            xs = xb[0:Cin_p, 2 * Wo:2 * Wo + L].astype(jnp.float32)
            r = jnp.maximum(xs * c[0:Cin_p, 4:5], 0.0)            # relu(x*mask_res)
            if has_down:
                rd = jnp.dot(wd_ref[...], r.astype(jnp.bfloat16),
                             preferred_element_type=jnp.float32)  # (Co_p, L)
                r = rd * c[0:Co_p, 6:7] + c[0:Co_p, 7:8]          # bn_d*mask2 folded
            else:
                r = r[0:Co_p, :] * c[0:Co_p, 5:6]                 # * mask2

            out = jnp.maximum(out + r, 0.0)
            o_ref[b] = out.astype(o_ref.dtype)                    # lane-dense store

    return kernel


def res_block_pallas(x_nchw, p, stride, eps=1e-5):
    """ResBlock eval forward. x_nchw: (N, Cin, H, W) f32. Returns NCHW bf16."""
    N, Cin, H, W = x_nchw.shape
    assert stride in (1, 2) and H % stride == 0 and W % stride == 0
    C1, Cout = p['w1'].shape[0], p['w2'].shape[0]
    has_down = 'wd' in p
    if not has_down:
        assert Cin == Cout and stride == 1, \
            "identity residual requires Cin == Cout and stride == 1"
    Ho, Wo = H // stride, W // stride
    L = Ho * Wo
    G = stride * stride

    # channel padding: 16 for dims used as bf16 sublane-concat pieces, 8 for out
    Cin_p = ((Cin + 15) // 16) * 16
    C1_p = ((C1 + 15) // 16) * 16
    Co_p = ((Cout + 7) // 8) * 8
    Cmax_p = max(Cin_p, C1_p, Co_p)

    # batch block per grid step: amortize per-step overhead, keep >= 2 steps
    B_blk = 1
    while N % (B_blk * 2) == 0 and N // (B_blk * 2) >= 2 and B_blk < 8:
        B_blk *= 2

    # ---- input prep: channels on sublanes, flattened (H-padded) spatial lanes
    xb = x_nchw.astype(jnp.bfloat16)
    if stride == 2:
        xr = xb.reshape(N, Cin, Ho, 2, Wo, 2)
        xr = jnp.transpose(xr, (0, 3, 5, 1, 2, 4))        # (N, a, b, Cin, Ho, Wo)
        xr = jnp.pad(xr, ((0, 0), (0, 0), (0, 0), (0, Cin_p - Cin), (0, 0), (0, 0)))
        xg = xr.reshape(N, G * Cin_p, Ho, Wo)
    else:
        xg = jnp.pad(xb, ((0, 0), (0, Cin_p - Cin), (0, 0), (0, 0)))
    xg = jnp.pad(xg, ((0, 0), (0, 0), (2, 2), (0, 0)))    # 2 zero rows top/bottom
    Lp1 = (Ho + 4) * Wo
    x_prep = xg.reshape(N, G * Cin_p, Lp1)

    # ---- weights: OIHW -> (Cout_p, 9*Cin_p) im2col layout, bf16 -------------
    def conv_mat(w, co_p, ci_p):
        co, ci = w.shape[0], w.shape[1]
        wt = jnp.transpose(w, (0, 2, 3, 1))               # (O, kh, kw, I)
        wt = jnp.pad(wt, ((0, co_p - co), (0, 0), (0, 0), (0, ci_p - ci)))
        return wt.reshape(co_p, 9 * ci_p).astype(jnp.bfloat16)

    w1m = conv_mat(p['w1'], C1_p, Cin_p)
    w2m = conv_mat(p['w2'], Co_p, C1_p)

    # ---- folded BN / mask constants: a single (Cmax_p, 8) block --------------
    inv1 = 1.0 / jnp.sqrt(p['rv1'] + eps)
    s1 = p['g1'] * inv1 * p['mask1']
    b1 = (p['b1'] - p['g1'] * p['rm1'] * inv1) * p['mask1']
    inv2 = 1.0 / jnp.sqrt(p['rv2'] + eps)
    s2 = p['g2'] * inv2 * p['mask2']                      # mask2 folded into bn2
    b2 = (p['b2'] - p['g2'] * p['rm2'] * inv2) * p['mask2']
    wres = p['mask_res']
    m2 = p['mask2']
    if has_down:
        invd = 1.0 / jnp.sqrt(p['rvd'] + eps)
        ds = p['gd'] * invd * p['mask2']                  # mask2 folded into bn_d
        db = (p['bd'] - p['gd'] * p['rmd'] * invd) * p['mask2']
    else:
        ds = jnp.zeros((Cout,), jnp.float32)
        db = jnp.zeros((Cout,), jnp.float32)

    def padc(v):
        return jnp.pad(v.astype(jnp.float32), (0, Cmax_p - v.shape[0]))

    consts = jnp.stack([padc(s1), padc(b1), padc(s2), padc(b2),
                        padc(wres), padc(m2), padc(ds), padc(db)], axis=1)

    # W-boundary masks on the flattened lane axis (built host-side, bf16)
    col = jnp.arange(L, dtype=jnp.int32) % Wo
    lmask = (col > 0).astype(jnp.bfloat16).reshape(1, L)
    rmask = (col < (Wo - 1)).astype(jnp.bfloat16).reshape(1, L)

    inputs = [x_prep, w1m, w2m, consts, lmask, rmask]
    in_specs = [
        pl.BlockSpec((B_blk, G * Cin_p, Lp1), lambda n: (n, 0, 0)),
        pl.BlockSpec((C1_p, 9 * Cin_p), lambda n: (0, 0)),
        pl.BlockSpec((Co_p, 9 * C1_p), lambda n: (0, 0)),
        pl.BlockSpec((Cmax_p, 8), lambda n: (0, 0)),
        pl.BlockSpec((1, L), lambda n: (0, 0)),
        pl.BlockSpec((1, L), lambda n: (0, 0)),
    ]
    if has_down:
        wdm = jnp.pad(p['wd'][:, :, 0, 0],
                      ((0, Co_p - Cout), (0, Cin_p - Cin))).astype(jnp.bfloat16)
        inputs.append(wdm)
        in_specs.append(pl.BlockSpec((Co_p, Cin_p), lambda n: (0, 0)))

    kernel = _make_kernel(stride, Cin_p, C1_p, Co_p, Ho, Wo, B_blk, has_down)

    # ---- cost estimate + VMEM budget (includes 9x im2col intermediates) -----
    flops = 2 * N * L * (9 * Cin_p * C1_p + 9 * C1_p * Co_p
                         + (Cin_p * Co_p if has_down else 0))
    w_bytes = (C1_p * 9 * Cin_p + Co_p * 9 * C1_p
               + (Co_p * Cin_p if has_down else 0)) * 2 + Cmax_p * 8 * 4 + 2 * L * 2
    bytes_accessed = N * G * Cin_p * Lp1 * 2 + N * Co_p * L * 2 + w_bytes

    x_blk = B_blk * G * Cin_p * Lp1 * 2
    o_blk = B_blk * Co_p * L * 2
    inter = (L * (2 * 9 * Cin_p + 2 * 9 * C1_p          # bf16 im2col matrices
                  + 6 * C1_p + 8 * Co_p + 4 * Cin_p)    # f32 acc/out/residual
             + 2 * C1_p * (L + 4 * Wo))                 # padded mid
    per_step = 2 * (x_blk + o_blk) + 2 * w_bytes + 2 * inter
    try:
        cap = int(pltpu.get_tpu_info().vmem_capacity_bytes * 3 // 4)
    except Exception:
        cap = 48 * 2 ** 20                              # safe on v7x (64 MiB/TC)
    vmem_limit = int(min(cap, max(32 * 2 ** 20, per_step)))

    out = pl.pallas_call(
        kernel,
        out_shape=jax.ShapeDtypeStruct((N, Co_p, L), jnp.bfloat16),
        grid_spec=pltpu.PrefetchScalarGridSpec(
            num_scalar_prefetch=0,
            grid=(N // B_blk,),
            in_specs=in_specs,
            out_specs=pl.BlockSpec((B_blk, Co_p, L), lambda n: (n, 0, 0)),
        ),
        compiler_params=pltpu.CompilerParams(
            dimension_semantics=("parallel",),
            vmem_limit_bytes=vmem_limit),
        cost_estimate=pl.CostEstimate(
            flops=int(flops), transcendentals=0,
            bytes_accessed=int(bytes_accessed)),
    )(*inputs)

    # trim channel padding, restore NCHW spatial dims (pure reshape/slice glue)
    return out[:, :Cout, :].reshape(N, Cout, Ho, Wo)


# ---------------------------------------------------------------------------
# Pure-JAX reference (same eval-mode semantics), NCHW like the PyTorch module.
# ---------------------------------------------------------------------------
def res_block_ref(x_nchw, p, stride, eps=1e-5):
    x = x_nchw.astype(jnp.float32)

    def conv(v, w, s, pad):
        return jax.lax.conv_general_dilated(
            v, w, (s, s), ((pad, pad), (pad, pad)),
            dimension_numbers=('NCHW', 'OIHW', 'NCHW'))

    def bn(v, g, b, rm, rv):
        sh = (1, -1, 1, 1)
        return ((v - rm.reshape(sh)) / jnp.sqrt(rv.reshape(sh) + eps)
                * g.reshape(sh) + b.reshape(sh))

    def chan(v):
        return v.reshape(1, -1, 1, 1)

    out = conv(x, p['w1'], stride, 1)
    out = bn(out, p['g1'], p['b1'], p['rm1'], p['rv1']) * chan(p['mask1'])
    out = jax.nn.relu(out)
    out = conv(out, p['w2'], 1, 1)
    out = bn(out, p['g2'], p['b2'], p['rm2'], p['rv2'])
    res = jax.nn.relu(x * chan(p['mask_res']))
    if 'wd' in p:
        res = bn(conv(res, p['wd'], stride, 0),
                 p['gd'], p['bd'], p['rmd'], p['rvd'])
    out = out + res
    out = jax.nn.relu(out * chan(p['mask2']))
    return out


def init_params(key, in_planes, mid_arg, out_planes, stride):
    """Deterministic synthetic parameters matching ResBlock.__init__ shapes."""
    assert mid_arg > in_planes
    mid_planes = mid_arg - out_planes + in_planes     # self.mid_planes
    c1 = mid_planes - in_planes                       # conv1 output channels
    ks = jax.random.split(key, 20)
    p = {}
    p['w1'] = 0.2 * jax.random.normal(ks[0], (c1, in_planes, 3, 3), jnp.float32)
    p['g1'] = 1.0 + 0.1 * jax.random.normal(ks[1], (c1,), jnp.float32)
    p['b1'] = 0.1 * jax.random.normal(ks[2], (c1,), jnp.float32)
    p['rm1'] = 0.1 * jax.random.normal(ks[3], (c1,), jnp.float32)
    p['rv1'] = jax.random.uniform(ks[4], (c1,), jnp.float32, 0.5, 1.5)
    p['mask1'] = jnp.ones((c1,), jnp.float32)                 # nn.init.ones_
    p['w2'] = 0.2 * jax.random.normal(ks[5], (out_planes, c1, 3, 3), jnp.float32)
    p['g2'] = 1.0 + 0.1 * jax.random.normal(ks[6], (out_planes,), jnp.float32)
    p['b2'] = 0.1 * jax.random.normal(ks[7], (out_planes,), jnp.float32)
    p['rm2'] = 0.1 * jax.random.normal(ks[8], (out_planes,), jnp.float32)
    p['rv2'] = jax.random.uniform(ks[9], (out_planes,), jnp.float32, 0.5, 1.5)
    p['mask2'] = jnp.ones((out_planes,), jnp.float32)         # nn.init.ones_
    p['mask_res'] = jnp.ones((in_planes,), jnp.float32)       # nn.init.ones_
    if in_planes != out_planes or stride != 1:
        p['wd'] = 0.2 * jax.random.normal(ks[10], (out_planes, in_planes, 1, 1),
                                          jnp.float32)
        p['gd'] = 1.0 + 0.1 * jax.random.normal(ks[11], (out_planes,), jnp.float32)
        p['bd'] = 0.1 * jax.random.normal(ks[12], (out_planes,), jnp.float32)
        p['rmd'] = 0.1 * jax.random.normal(ks[13], (out_planes,), jnp.float32)
        p['rvd'] = jax.random.uniform(ks[14], (out_planes,), jnp.float32, 0.5, 1.5)
    return p


if __name__ == "__main__":
    key = jax.random.PRNGKey(0)
    kx, kp1, kp2 = jax.random.split(key, 3)

    # Input in PyTorch NCHW convention: (batch=2, channels=4, 16, 16)
    x = jax.random.normal(kx, (2, 4, 16, 16), jnp.float32)

    # bf16 activations/weights + bf16 writeback with f32 MXU accumulation.
    RTOL, ATOL = 5e-2, 8e-2

    # Config A: identity residual (in == out, stride == 1)
    pA = init_params(kp1, in_planes=4, mid_arg=8, out_planes=4, stride=1)
    outA = jax.block_until_ready(res_block_pallas(x, pA, stride=1))
    refA = jax.block_until_ready(res_block_ref(x, pA, stride=1))
    dA = np.abs(np.asarray(outA.astype(jnp.float32)) - np.asarray(refA))
    assert np.allclose(np.asarray(outA.astype(jnp.float32)), np.asarray(refA),
                       rtol=RTOL, atol=ATOL), f"config A mismatch, max diff {dA.max()}"

    # Config B: projection downsample (in != out, stride == 2)
    pB = init_params(kp2, in_planes=4, mid_arg=12, out_planes=8, stride=2)
    outB = jax.block_until_ready(res_block_pallas(x, pB, stride=2))
    refB = jax.block_until_ready(res_block_ref(x, pB, stride=2))
    dB = np.abs(np.asarray(outB.astype(jnp.float32)) - np.asarray(refB))
    assert np.allclose(np.asarray(outB.astype(jnp.float32)), np.asarray(refB),
                       rtol=RTOL, atol=ATOL), f"config B mismatch, max diff {dB.max()}"

    print("KERNEL_OK")
</pallas_src>

<mosaic_0001>
module attributes {stable_mosaic.version = 11 : i64} {
  func.func @kernel(%arg0: i32, %arg1: memref<1x16x320xbf16, #tpu.memory_space<vmem>>, %arg2: memref<16x144xbf16, #tpu.memory_space<vmem>>, %arg3: memref<8x144xbf16, #tpu.memory_space<vmem>>, %arg4: memref<16x8xf32, #tpu.memory_space<vmem>>, %arg5: memref<1x256xbf16, #tpu.memory_space<vmem>>, %arg6: memref<1x256xbf16, #tpu.memory_space<vmem>>, %arg7: memref<1x8x256xbf16, #tpu.memory_space<vmem>>) attributes {dimension_semantics = [#tpu.dimension_semantics<parallel>], iteration_bounds = array<i64: 2>, scalar_prefetch = 0 : i64, scratch_operands = 0 : i64, tpu.core_type = #tpu.core_type<tc>, window_params = [{transform_indices = @transform_0, window_bounds = array<i64: 1, 16, 320>}, {pipeline_mode = #tpu.pipeline_mode<synchronous>, transform_indices = @transform_1, window_bounds = array<i64: 16, 144>}, {pipeline_mode = #tpu.pipeline_mode<synchronous>, transform_indices = @transform_2, window_bounds = array<i64: 8, 144>}, {pipeline_mode = #tpu.pipeline_mode<synchronous>, transform_indices = @transform_3, window_bounds = array<i64: 16, 8>}, {pipeline_mode = #tpu.pipeline_mode<synchronous>, transform_indices = @transform_4, window_bounds = array<i64: 1, 256>}, {pipeline_mode = #tpu.pipeline_mode<synchronous>, transform_indices = @transform_5, window_bounds = array<i64: 1, 256>}, {transform_indices = @transform_6, window_bounds = array<i64: 1, 8, 256>}]} {
    %c0 = arith.constant 0 : index
    %c0_0 = arith.constant 0 : index
    %0 = vector.load %arg5[%c0, %c0_0] : memref<1x256xbf16, #tpu.memory_space<vmem>>, vector<1x256xbf16>
    %c0_1 = arith.constant 0 : index
    %c0_2 = arith.constant 0 : index
    %1 = vector.load %arg6[%c0_1, %c0_2] : memref<1x256xbf16, #tpu.memory_space<vmem>>, vector<1x256xbf16>
    %c0_3 = arith.constant 0 : index
    %c0_4 = arith.constant 0 : index
    %2 = vector.load %arg4[%c0_3, %c0_4] : memref<16x8xf32, #tpu.memory_space<vmem>>, vector<16x8xf32>
    %c0_5 = arith.constant 0 : index
    %c0_6 = arith.constant 0 : index
    %3 = vector.load %arg2[%c0_5, %c0_6] : memref<16x144xbf16, #tpu.memory_space<vmem>>, vector<16x144xbf16>
    %c0_7 = arith.constant 0 : index
    %c0_8 = arith.constant 0 : index
    %4 = vector.load %arg3[%c0_7, %c0_8] : memref<8x144xbf16, #tpu.memory_space<vmem>>, vector<8x144xbf16>
    %cst = arith.constant 0.000000e+00 : bf16
    %5 = vector.broadcast %cst : bf16 to vector<16x32xbf16>
    %c0_9 = arith.constant 0 : index
    %c0_10 = arith.constant 0 : index
    %c0_11 = arith.constant 0 : index
    %6 = vector.load %arg1[%c0_9, %c0_10, %c0_11] : memref<1x16x320xbf16, #tpu.memory_space<vmem>>, vector<1x16x320xbf16>
    %7 = vector.shape_cast %6 : vector<1x16x320xbf16> to vector<16x320xbf16>
    %8 = vector.extract_strided_slice %7 {offsets = [0, 15], sizes = [16, 256], strides = [1, 1]} : vector<16x320xbf16> to vector<16x256xbf16>
    %9 = vector.broadcast %0 : vector<1x256xbf16> to vector<16x256xbf16>
    %10 = arith.mulf %8, %9 : vector<16x256xbf16>
    %11 = vector.extract_strided_slice %7 {offsets = [0, 16], sizes = [16, 256], strides = [1, 1]} : vector<16x320xbf16> to vector<16x256xbf16>
    %12 = vector.extract_strided_slice %7 {offsets = [0, 17], sizes = [16, 256], strides = [1, 1]} : vector<16x320xbf16> to vector<16x256xbf16>
    %13 = vector.broadcast %1 : vector<1x256xbf16> to vector<16x256xbf16>
    %14 = arith.mulf %12, %13 : vector<16x256xbf16>
    %15 = vector.extract_strided_slice %7 {offsets = [0, 31], sizes = [16, 256], strides = [1, 1]} : vector<16x320xbf16> to vector<16x256xbf16>
    %16 = vector.broadcast %0 : vector<1x256xbf16> to vector<16x256xbf16>
    %17 = arith.mulf %15, %16 : vector<16x256xbf16>
    %18 = vector.extract_strided_slice %7 {offsets = [0, 32], sizes = [16, 256], strides = [1, 1]} : vector<16x320xbf16> to vector<16x256xbf16>
    %19 = vector.extract_strided_slice %7 {offsets = [0, 33], sizes = [16, 256], strides = [1, 1]} : vector<16x320xbf16> to vector<16x256xbf16>
    %20 = vector.broadcast %1 : vector<1x256xbf16> to vector<16x256xbf16>
    %21 = arith.mulf %19, %20 : vector<16x256xbf16>
    %22 = vector.extract_strided_slice %7 {offsets = [0, 47], sizes = [16, 256], strides = [1, 1]} : vector<16x320xbf16> to vector<16x256xbf16>
    %23 = vector.broadcast %0 : vector<1x256xbf16> to vector<16x256xbf16>
    %24 = arith.mulf %22, %23 : vector<16x256xbf16>
    %25 = vector.extract_strided_slice %7 {offsets = [0, 48], sizes = [16, 256], strides = [1, 1]} : vector<16x320xbf16> to vector<16x256xbf16>
    %26 = vector.extract_strided_slice %7 {offsets = [0, 49], sizes = [16, 256], strides = [1, 1]} : vector<16x320xbf16> to vector<16x256xbf16>
    %27 = vector.broadcast %1 : vector<1x256xbf16> to vector<16x256xbf16>
    %28 = arith.mulf %26, %27 : vector<16x256xbf16>
    %29 = tpu.concatenate %10, %11, %14, %17, %18, %21, %24, %25, %28 in 0 : vector<16x256xbf16>, vector<16x256xbf16>, vector<16x256xbf16>, vector<16x256xbf16>, vector<16x256xbf16>, vector<16x256xbf16>, vector<16x256xbf16>, vector<16x256xbf16>, vector<16x256xbf16> -> vector<144x256xbf16>
    %cst_12 = arith.constant dense<0.000000e+00> : vector<16x256xf32>
    %30 = tpu.matmul %3, %29, %cst_12 {dimension_numbers = #tpu.dot_dimension_numbers<[1], [0], [0], [1], [0, 0, 1, 1], [], []>} : vector<16x144xbf16>, vector<144x256xbf16>, vector<16x256xf32> -> vector<16x256xf32>
    %31 = vector.extract_strided_slice %2 {offsets = [0, 0], sizes = [16, 1], strides = [1, 1]} : vector<16x8xf32> to vector<16x1xf32>
    %32 = vector.broadcast %31 : vector<16x1xf32> to vector<16x256xf32>
    %33 = arith.mulf %30, %32 : vector<16x256xf32>
    %34 = vector.extract_strided_slice %2 {offsets = [0, 1], sizes = [16, 1], strides = [1, 1]} : vector<16x8xf32> to vector<16x1xf32>
    %35 = vector.broadcast %34 : vector<16x1xf32> to vector<16x256xf32>
    %36 = arith.addf %33, %35 : vector<16x256xf32>
    %cst_13 = arith.constant 0.000000e+00 : f32
    %37 = vector.broadcast %cst_13 : f32 to vector<16x256xf32>
    %38 = arith.maximumf %36, %37 : vector<16x256xf32>
    %39 = arith.truncf %38 : vector<16x256xf32> to vector<16x256xbf16>
    %40 = tpu.concatenate %5, %39, %5 in 1 : vector<16x32xbf16>, vector<16x256xbf16>, vector<16x32xbf16> -> vector<16x320xbf16>
    %41 = vector.extract_strided_slice %40 {offsets = [0, 15], sizes = [16, 256], strides = [1, 1]} : vector<16x320xbf16> to vector<16x256xbf16>
    %42 = vector.broadcast %0 : vector<1x256xbf16> to vector<16x256xbf16>
    %43 = arith.mulf %41, %42 : vector<16x256xbf16>
    %44 = vector.extract_strided_slice %40 {offsets = [0, 16], sizes = [16, 256], strides = [1, 1]} : vector<16x320xbf16> to vector<16x256xbf16>
    %45 = vector.extract_strided_slice %40 {offsets = [0, 17], sizes = [16, 256], strides = [1, 1]} : vector<16x320xbf16> to vector<16x256xbf16>
    %46 = vector.broadcast %1 : vector<1x256xbf16> to vector<16x256xbf16>
    %47 = arith.mulf %45, %46 : vector<16x256xbf16>
    %48 = vector.extract_strided_slice %40 {offsets = [0, 31], sizes = [16, 256], strides = [1, 1]} : vector<16x320xbf16> to vector<16x256xbf16>
    %49 = vector.broadcast %0 : vector<1x256xbf16> to vector<16x256xbf16>
    %50 = arith.mulf %48, %49 : vector<16x256xbf16>
    %51 = vector.extract_strided_slice %40 {offsets = [0, 32], sizes = [16, 256], strides = [1, 1]} : vector<16x320xbf16> to vector<16x256xbf16>
    %52 = vector.extract_strided_slice %40 {offsets = [0, 33], sizes = [16, 256], strides = [1, 1]} : vector<16x320xbf16> to vector<16x256xbf16>
    %53 = vector.broadcast %1 : vector<1x256xbf16> to vector<16x256xbf16>
    %54 = arith.mulf %52, %53 : vector<16x256xbf16>
    %55 = vector.extract_strided_slice %40 {offsets = [0, 47], sizes = [16, 256], strides = [1, 1]} : vector<16x320xbf16> to vector<16x256xbf16>
    %56 = vector.broadcast %0 : vector<1x256xbf16> to vector<16x256xbf16>
    %57 = arith.mulf %55, %56 : vector<16x256xbf16>
    %58 = vector.extract_strided_slice %40 {offsets = [0, 48], sizes = [16, 256], strides = [1, 1]} : vector<16x320xbf16> to vector<16x256xbf16>
    %59 = vector.extract_strided_slice %40 {offsets = [0, 49], sizes = [16, 256], strides = [1, 1]} : vector<16x320xbf16> to vector<16x256xbf16>
    %60 = vector.broadcast %1 : vector<1x256xbf16> to vector<16x256xbf16>
    %61 = arith.mulf %59, %60 : vector<16x256xbf16>
    %62 = tpu.concatenate %43, %44, %47, %50, %51, %54, %57, %58, %61 in 0 : vector<16x256xbf16>, vector<16x256xbf16>, vector<16x256xbf16>, vector<16x256xbf16>, vector<16x256xbf16>, vector<16x256xbf16>, vector<16x256xbf16>, vector<16x256xbf16>, vector<16x256xbf16> -> vector<144x256xbf16>
    %cst_14 = arith.constant dense<0.000000e+00> : vector<8x256xf32>
    %63 = tpu.matmul %4, %62, %cst_14 {dimension_numbers = #tpu.dot_dimension_numbers<[1], [0], [0], [1], [0, 0, 1, 1], [], []>} : vector<8x144xbf16>, vector<144x256xbf16>, vector<8x256xf32> -> vector<8x256xf32>
    %64 = vector.extract_strided_slice %2 {offsets = [0, 2], sizes = [8, 1], strides = [1, 1]} : vector<16x8xf32> to vector<8x1xf32>
    %65 = vector.broadcast %64 : vector<8x1xf32> to vector<8x256xf32>
    %66 = arith.mulf %63, %65 : vector<8x256xf32>
    %67 = vector.extract_strided_slice %2 {offsets = [0, 3], sizes = [8, 1], strides = [1, 1]} : vector<16x8xf32> to vector<8x1xf32>
    %68 = vector.broadcast %67 : vector<8x1xf32> to vector<8x256xf32>
    %69 = arith.addf %66, %68 : vector<8x256xf32>
    %70 = vector.extract_strided_slice %7 {offsets = [0, 32], sizes = [16, 256], strides = [1, 1]} : vector<16x320xbf16> to vector<16x256xbf16>
    %71 = arith.extf %70 : vector<16x256xbf16> to vector<16x256xf32>
    %72 = vector.extract_strided_slice %2 {offsets = [0, 4], sizes = [16, 1], strides = [1, 1]} : vector<16x8xf32> to vector<16x1xf32>
    %73 = vector.broadcast %72 : vector<16x1xf32> to vector<16x256xf32>
    %74 = arith.mulf %71, %73 : vector<16x256xf32>
    %cst_15 = arith.constant 0.000000e+00 : f32
    %75 = vector.broadcast %cst_15 : f32 to vector<16x256xf32>
    %76 = arith.maximumf %74, %75 : vector<16x256xf32>
    %77 = vector.extract_strided_slice %76 {offsets = [0, 0], sizes = [8, 256], strides = [1, 1]} : vector<16x256xf32> to vector<8x256xf32>
    %78 = vector.extract_strided_slice %2 {offsets = [0, 5], sizes = [8, 1], strides = [1, 1]} : vector<16x8xf32> to vector<8x1xf32>
    %79 = vector.broadcast %78 : vector<8x1xf32> to vector<8x256xf32>
    %80 = arith.mulf %77, %79 : vector<8x256xf32>
    %81 = arith.addf %69, %80 : vector<8x256xf32>
    %cst_16 = arith.constant 0.000000e+00 : f32
    %82 = vector.broadcast %cst_16 : f32 to vector<8x256xf32>
    %83 = arith.maximumf %81, %82 : vector<8x256xf32>
    %84 = arith.truncf %83 : vector<8x256xf32> to vector<8x256xbf16>
    %c0_17 = arith.constant 0 : index
    %c0_18 = arith.constant 0 : index
    %c0_19 = arith.constant 0 : index
    %85 = vector.load %arg7[%c0_17, %c0_18, %c0_19] : memref<1x8x256xbf16, #tpu.memory_space<vmem>>, vector<1x8x256xbf16>
    %86 = vector.shape_cast %85 : vector<1x8x256xbf16> to vector<8x256xbf16>
    %87 = vector.shape_cast %84 : vector<8x256xbf16> to vector<1x8x256xbf16>
    tpu.vector_store %arg7[%c0_17, %c0_18, %c0_19], %87 {strides = array<i32>} : memref<1x8x256xbf16, #tpu.memory_space<vmem>>, vector<1x8x256xbf16>,
    return
  }
  func.func @transform_0(%arg0: i32) -> (i32, i32, i32) {
    %c0_i32 = arith.constant 0 : i32
    %c0_i32_0 = arith.constant 0 : i32
    %c0_i32_1 = arith.constant 0 : i32
    return %arg0, %c0_i32, %c0_i32_0 : i32, i32, i32
  }
  func.func @transform_1(%arg0: i32) -> (i32, i32) {
    %c0_i32 = arith.constant 0 : i32
    %c0_i32_0 = arith.constant 0 : i32
    %c0_i32_1 = arith.constant 0 : i32
    return %c0_i32, %c0_i32_0 : i32, i32
  }
  func.func @transform_2(%arg0: i32) -> (i32, i32) {
    %c0_i32 = arith.constant 0 : i32
    %c0_i32_0 = arith.constant 0 : i32
    %c0_i32_1 = arith.constant 0 : i32
    return %c0_i32, %c0_i32_0 : i32, i32
  }
  func.func @transform_3(%arg0: i32) -> (i32, i32) {
    %c0_i32 = arith.constant 0 : i32
    %c0_i32_0 = arith.constant 0 : i32
    %c0_i32_1 = arith.constant 0 : i32
    return %c0_i32, %c0_i32_0 : i32, i32
  }
  func.func @transform_4(%arg0: i32) -> (i32, i32) {
    %c0_i32 = arith.constant 0 : i32
    %c0_i32_0 = arith.constant 0 : i32
    %c0_i32_1 = arith.constant 0 : i32
    return %c0_i32, %c0_i32_0 : i32, i32
  }
  func.func @transform_5(%arg0: i32) -> (i32, i32) {
    %c0_i32 = arith.constant 0 : i32
    %c0_i32_0 = arith.constant 0 : i32
    %c0_i32_1 = arith.constant 0 : i32
    return %c0_i32, %c0_i32_0 : i32, i32
  }
  func.func @transform_6(%arg0: i32) -> (i32, i32, i32) {
    %c0_i32 = arith.constant 0 : i32
    %c0_i32_0 = arith.constant 0 : i32
    %c0_i32_1 = arith.constant 0 : i32
    return %arg0, %c0_i32, %c0_i32_0 : i32, i32, i32
  }
}

</mosaic_0001>

<bundles_post_ra>
// kernel: tpu_custom_call.1
= control target key start
LH: loop header
LB: loop body
LE: loop exit
PB: predicated region body
PF: predicated region fallthrough
CT: control target
= control target key end

     0   :  { %11 = vsyncpa [#allocation3], 0  ;;  %s2014_s0 = inlined_call_operand.hbm [shape: bf16[2,16,320], index: 0, kind: input, shape index: {}]   ;;  %s2015_s1 = inlined_call_operand.vmem [shape: bf16[16,144], index: 1, kind: input, shape index: {}]   ;;  %s2016_s2 = inlined_call_operand.vmem [shape: bf16[8,144], index: 2, kind: input, shape index: {}]   ;;  %s2017_s3 = inlined_call_operand.vmem [shape: f32[16,8], index: 3, kind: input, shape index: {}]   ;;  %s2018_s4 = inlined_call_operand.vmem [shape: bf16[1,256], index: 4, kind: input, shape index: {}]   ;;  %s2019_s5 = inlined_call_operand.vmem [shape: bf16[1,256], index: 5, kind: input, shape index: {}]   ;;  %s2020_s6 = inlined_call_operand.hbm [shape: bf16[2,8,256], index: 6, kind: output, shape index: {}]  }
   0x1   :  { %13 = vsyncpa [#allocation3 + $0x1], 0 }
   0x2   :  { %14 = vsyncpa [#allocation4], 0 }
   0x3   :  { %16 = vsyncpa [#allocation4 + $0x1], 0  ;;  %s1520_s21 = smov 0   ;;  %s1522_s22 = smov 0  }
   0x4   :  { %s1524_s23 = smov 0   ;;  %s1526_s24 = smov 0  }
   0x5 LB: > { %s1541_s25 = sadd.s32 4294967295, %s1456_s24   ;;  %s1225_s26 = sadd.s32 4294967294, %s1456_s24   ;;  %s1456_s24 = sphi %s1526_s24, %s2052_s24   ;;  %s1452_s23 = sphi %s1524_s23, %s2051_s23   ;;  %s1448_s22 = sphi %s1522_s22, %s2050_s22   ;;  %s1444_s21 = sphi %s1520_s21, %s2049_s21  }
   0x6   : > { %s1545_s27 = sadd.s32 1, %s1456_s24   ;;  %s29_s28 = sadd.s32 1, %s1452_s23 }
   0x7   : > { %s26_s29 = ssub.s32 %s1456_s24, %s1545_s27  ;;  %p36_p0 = scmp.ne.s32.totalorder %s1452_s23, %s1448_s22 }
   0x8   : > { %p27_p1 = scmp.eq.s32.totalorder %s26_s29, 0  ;;  %p37_p2 = scmp.eq.s32.totalorder %s1456_s24, 0 }
   0x9   : > { %p42_p3 = scmp.ne.s32.totalorder %s1448_s22, %s1444_s21  ;;  %p43_p4 = scmp.eq.s32.totalorder %s1541_s25, 0 }
   0xa   : > { %s1557_s30 = scalar_select %p27_p1, %s1452_s23, %s29_s28  }
   0xb   : > { %p38_p5 = por %p37_p2, %p36_p0  ;;  %p1559_p6 = por %p43_p4, %p42_p3 }
   0xc   : > { %p171_p7 = scmp.eq.s32.totalorder %s1541_s25, 1  ;;  %p177_p8 = scmp.eq.s32.totalorder %s1225_s26, 1 }
   0xd   : > { %p1285_p10 = scmp.lt.s32.totalorder %s1456_s24, 2  ;;  %s212_s10 = sand.u32 1, %s1452_s23  }
   0xe   : > { %p1566_p11 = por %p171_p7, %p36_p0  ;;  %p1570_p12 = por %p177_p8, %p42_p3 }
   0xf   : > { %s1271_s11 = smul.u32 384, %s1456_s24  ;;  %p1581_p13 = pnand %p1285_p10, %p38_p5 }
  0x10   : > { %s2036_s8 = scalar_select %p1566_p11, 1, 0 }
  0x11   : > { %s2037_s9 = scalar_select %p1570_p12, 1, 0 }
  0x12   : > { %s1270_s12 = smul.u32 24, %s212_s10  ;;  %s1579_s15 = scalar_lea.hbm %s2014_s0, %s1271_s11 }
  0x13   : > { %s1587_s19 = scalar_lea.sflag [#allocation3], %s212_s10  ;;  %s1360_s20 = scalar_lea.hbm %s1579_s15, 384 }
  0x14   : > { %s216_s17 = scalar_lea.vmem [#allocation2], %s1270_s12  ;;  %p1361_p0 = scmp.ne.s32.totalorder %s1579_s15, %s1360_s20 }
  0x15   : > { %s223_s18 = sshll.u32 %s216_s17, 4  ;;  %p1362_p1 = pneg %p1581_p13  ;;  %s1585_s18 = int_to_ptr.vmem [resolvable:$true] %s223_s18 }
  0x16   : > { %s1365_s29 = scalar_lea.hbm %s2014_s0, 768  ;;  %p1366_p4 = scmp.lt.u32.totalorder %s1579_s15, %s2014_s0 }
  0x17   : > { %p1363_p2 = pnand %p1362_p1, %p1361_p0  ;;  %p1367_p5 = scmp.lt.u32.totalorder %s1365_s29, %s1360_s20 }
  0x18   : > { %p1369_p8 = scmp.lt.u32.totalorder %s1360_s20, %s1579_s15 }
  0x19   : > { %p1364_p3 = pneg %p1363_p2  ;;  %p1368_p7 = por %p1367_p5, %p1366_p4 }
  0x1b   : > { %p1370_p10 = por %p1369_p8, %p1368_p7 }
  0x1d   : > { %p1371_p9 = pnand %p1370_p10, %p1364_p3 }
  0x1f   : > { %1374 = shalt.err (!%p1371_p9)
}
  0x20   : > { %s1375_s10 = scalar_lea.vmem %s1585_s18, 384  ;;  %s1458_s12 = smov [#allocation2]  }
  0x21   : > { %p1376_p0 = scmp.ne.s32.totalorder %s1585_s18, %s1375_s10  ;;  %s1380_s14 = sshll.u32 %s1458_s12, 4  ;;  %s1381_s14 = int_to_ptr.vmem [resolvable:$false] %s1380_s14 }
  0x22   : > { %s1382_s17 = scalar_lea.vmem %s1381_s14, 768  ;;  %p1383_p11 = scmp.lt.s32.totalorder %s1585_s18, %s1381_s14 }
  0x23   : > { %p1378_p2 = pnand %p1376_p0, %p1362_p1  ;;  %p1384_p4 = scmp.lt.s32.totalorder %s1382_s17, %s1375_s10 }
  0x25   : > { %p1379_p12 = pneg %p1378_p2  ;;  %p1385_p5 = por %p1384_p4, %p1383_p11 }
  0x27   : > { %p1386_p7 = pnand %p1385_p5, %p1379_p12 }
  0x29   : > { %1389 = shalt.err (!%p1386_p7)
}
  0x2a   : > { %s1459_s20 = smov 192   ;;  %s1460_s26 = smov 12  }
  0x2b   : > { %1280 = dma.hbm_to_vmem [thread:$0]  (!%p1581_p13), %s1579_s15, 384, %s1585_s18, %s1587_s19, %s1459_s20, %s1459_s20, %s1460_s26  }
  0x2c   : > { %p1229_p9 = scmp.ge.s32.totalorder %s1456_s24, 1  ;;  %p231_p1 = scmp.lt.s32.totalorder %s1456_s24, 3 }
  0x2e   : > { %p232_p3 = pnand %p1229_p9, %p231_p1 }
  0x2f   : > { %s1618_s28 = sand.u32 (!%p232_p3), 1, %s1448_s22  }
  0x30   : > { %235 = sbr.rel (%p232_p3) target bundleno = 1338 (0x53a), region = 44  ;;  %s238_s11 = scalar_lea.sflag (!%p232_p3), [#allocation3], %s1618_s28 }
  0x31   : > { %s1272_s29 = smul.u32 (!%p232_p3), 24, %s1618_s28 }
  0x33   : > { %s1622_s13 = scalar_lea.vmem (!%p232_p3), [#allocation2], %s1272_s29 }
  0x37   : > { %1435 = dma.done.wait (%p1559_p6), %s238_s11, 384  }
  0x38   : > { %1437 = vsyncadd (%p1559_p6), %s238_s11, 4294966912  ;;  %v294_v0 = vlaneseq  ;;  %v1461_v1 = vmov 1966171168   ;;  %s1462_s7 = smov 33   ;;  %s1463_s10 = smov 17   ;;  %v1661_v28 = vld [vmem:[%s1622_s13] sm:$0xff] }
  0x39   : > { %v292_v2 = vunpack.c.l.s4 %v1461_v1  ;;  %v1233_v6 = vld.sshfl [vmem:[%s2019_s5] sm:$0x11 pattern:$0x75316420]  ;;  %v1652_v26 = vld [vmem:[%s1622_s13 + $0x14] sm:$0xf] }
  0x3a   : > { %v295_v3 = vshrl.u32 %v294_v0, 7  ;;  %v343_v8 = vcombine.high %v1233_v6, %v1233_v6  ;;  %v1231_v10 = vld.sshfl [vmem:[%s2018_s4] sm:$0x11 pattern:$0x75316420]  ;;  %s1464_s12 = smov 47  }
  0x3b   : > { %v293_v4 = vunpack.c.0.s8 %v292_v2  ;;  %v290_v11 = vcombine.high %v1231_v10, %v1231_v10  ;;  %v1649_v25 = vld [vmem:[%s1622_s13 + $0x8] sm:$0xf]  ;;  %s1465_s14 = smov 31   ;;  %v1664_v29 = vld [vmem:[%s1622_s13 + $0xc] sm:$0xff]  ;;  %s1466_s17 = smov 49   ;;  %vm391_vm0 = vcmask 252928  }
  0x3c   : > { %v310_v7 = vsub.s32 0, %v295_v3  ;;  %v1658_v27 = vcombine.low %v1649_v25, %v1652_v26  ;;  %s1467_s20 = smov 127   ;;  %v1671_v30 = vcombine.high %v1661_v28, %v1664_v29  ;;  %s1468_s26 = smov 111   ;;  %v1679_v31 = vcombine.low %v1661_v28, %v1664_v29 }
  0x3d   : > { %v296_v5 = vsub.s32 %v293_v4, %v295_v3  ;;  %s1469_s29 = smov 15   ;;  %vm380_vm1 = vcmask 138240   ;;  %s2032_s11 = smov 126   ;;  %vm402_vm2 = vcmask 269312   ;;  %vm413_vm3 = vcmask 384000  }
  0x3e   : > { %s2028_s15 = smov 96   ;;  %s2030_s16 = smov 112   ;;  %vm424_vm4 = vcmask 400384   ;;  %vm327_vm5 = vcmask 121856   ;;  %vm517_vm6 = vcmask 908288   ;;  %vm464_vm7 = vcmask 1039360  }
  0x3f   : > { %v350_v9 = vrot.slane %v1233_v6, %v296_v5  ;;  %v297_v12 = vrot.slane %v1231_v10, %v296_v5  ;;  %v357_v13 = vrot.slane %v343_v8, %v296_v5  ;;  %v304_v15 = vrot.slane %v290_v11, %v296_v5  ;;  %s2022_s18 = smov 110   ;;  %s2024_s19 = smov 95  }
  0x40   : > { %vm508_vm8 = vcmask 916480   ;;  %vm486_vm9 = vcmask 1031168   ;;  %vm539_vm10 = vcmask 900096   ;;  %vm570_vm11 = vcmask 777216   ;;  %p2046_p11 = scmp.ne.s32.totalorder %s2036_s8, 0 }
  0x41   : > { %v359_v14 = vpack.i.b16 %v350_v9, %v350_v9  ;;  %v306_v16 = vpack.i.b16 %v297_v12, %v297_v12  ;;  %v366_v18 = vpack.i.b16 %v357_v13, %v357_v13  ;;  %v313_v19 = vpack.i.b16 %v304_v15, %v304_v15 }
  0x42   : > { %vm561_vm12 = vcmask 785408   ;;  %vm2034_vm13 = vcmask 130048   ;;  %vm592_vm14 = vcmask 769024   ;;  %vm658_vm15 = vcmask 924672  }
  0x43   : > { %v1634_v17 = vrot.slane %v359_v14, %v310_v7  ;;  %v1636_v20 = vrot.slane %v366_v18, %v310_v7  ;;  %v1638_v21 = vrot.slane %v306_v16, %v310_v7  ;;  %v1640_v22 = vrot.slane %v313_v19, %v310_v7 }
  0x45   : > { %v1234_v23 = vcombine.low %v1634_v17, %v1636_v20  ;;  %v1232_v24 = vcombine.low %v1638_v21, %v1640_v22 }
  0x47   : > { %399 = vrot.lane.b32.xlu1 %v1234_v23, %s1462_s7  ;;  %377 = vrot.lane.b32.xlu0 %v1234_v23, %s1463_s10 }
  0x4b   : > { %410 = vrot.lane.b32.xlu1 %v1232_v24, %s1464_s12  ;;  %388 = vrot.lane.b32.xlu0 %v1232_v24, %s1465_s14 }
  0x4f   : > { %421 = vrot.lane.b32.xlu0 %v1234_v23, %s1466_s17  ;;  %462 = vrot.lane.b32.xlu1 %v1658_v27, %s1467_s20 }
  0x53   : > { %460 = vrot.lane.b32.xlu0 %v1671_v30, %s1467_s20  ;;  %513 = vrot.lane.b32.xlu1 %v1671_v30, %s1468_s26 }
  0x57   : > { %458 = vrot.lane.b32.xlu0 %v1679_v31, %s1467_s20  ;;  %324 = vrot.lane.b32.xlu1 %v1232_v24, %s1469_s29 }
  0x5b   : > { %515 = vrot.lane.b32.xlu0 %v1658_v27, %s1468_s26  ;;  %511 = vrot.lane.b32.xlu1 %v1679_v31, %s1468_s26 }
  0xb9   : > { %v400_v32 = vpop.permute.xlu1 %399  ;;  %v378_v33 = vpop.permute.xlu0 %377 }
  0xba   : > { %v379_v34 = vrot.slane %v378_v33, 4  ;;  %v401_v51 = vrot.slane %v400_v32, 4 }
  0xbc   : > { %v385_v35 = vmul.bf16 %v379_v34, %v1649_v25  ;;  %v387_v36 = vmul.bf16 %v379_v34, %v1652_v26  ;;  %v381_v45 = vsel %vm380_vm1, %v379_v34, %v378_v33  ;;  %v403_v56 = vsel %vm402_vm2, %v401_v51, %v400_v32 }
  0xbd   : > { %v411_v37 = vpop.permute.xlu1 %410  ;;  %v389_v38 = vpop.permute.xlu0 %388  ;;  %v384_v52 = vmul.bf16 %v381_v45, %v1661_v28  ;;  %v386_v53 = vmul.bf16 %v381_v45, %v1664_v29  ;;  %v406_v58 = vmul.bf16 %v403_v56, %v1661_v28  ;;  %v408_v59 = vmul.bf16 %v403_v56, %v1664_v29 }
  0xbe   : > { %v412_v39 = vrot.slane %v411_v37, 4  ;;  %v390_v40 = vrot.slane %v389_v38, 4  ;;  %v1243_v41 = vcombine.low %v385_v35, %v387_v36  ;;  %v407_v62 = vmul.bf16 %v401_v51, %v1649_v25 }
  0xbf   : > { %v1242_v57 = vcombine.high %v384_v52, %v386_v53  ;;  %v1241_v61 = vcombine.low %v384_v52, %v386_v53  ;;  %v409_v63 = vmul.bf16 %v401_v51, %v1652_v26  ;;  %v1248_v0 = vcombine.high %v406_v58, %v408_v59 }
  0xc0   : > { %v392_v42 = vsel %vm391_vm0, %v390_v40, %v389_v38  ;;  %484 = vrot.lane.b32.xlu0 %v1243_v41, %s2032_s11  ;;  %v418_v43 = vmul.bf16 %v412_v39, %v1649_v25  ;;  %v420_v44 = vmul.bf16 %v412_v39, %v1652_v26  ;;  %v396_v49 = vmul.bf16 %v390_v40, %v1649_v25 }
  0xc1   : > { %v395_v46 = vmul.bf16 %v392_v42, %v1661_v28  ;;  %v397_v47 = vmul.bf16 %v392_v42, %v1664_v29  ;;  %v398_v50 = vmul.bf16 %v390_v40, %v1652_v26  ;;  %v1249_v1 = vcombine.low %v407_v62, %v409_v63  ;;  %v463_v3 = vpop.permute.xlu1 %462  ;;  %v422_v5 = vpop.permute.xlu0 %421 }
  0xc2   : > { %v1252_v48 = vcombine.low %v418_v43, %v420_v44  ;;  %v414_v2 = vsel %vm413_vm3, %v412_v39, %v411_v37  ;;  %v1247_v4 = vcombine.low %v406_v58, %v408_v59  ;;  %v423_v8 = vrot.slane %v422_v5, 4 }
  0xc3   : > { %v1246_v54 = vcombine.low %v396_v49, %v398_v50  ;;  %v1245_v55 = vcombine.high %v395_v46, %v397_v47  ;;  %v1244_v60 = vcombine.low %v395_v46, %v397_v47  ;;  %v417_v6 = vmul.bf16 %v414_v2, %v1661_v28 }
  0xc4   : > { %559 = vrot.lane.b32.xlu0 %v1252_v48, %s2028_s15  ;;  %v419_v7 = vmul.bf16 %v414_v2, %v1664_v29  ;;  %v429_v12 = vmul.bf16 %v423_v8, %v1649_v25  ;;  %v431_v13 = vmul.bf16 %v423_v8, %v1652_v26  ;;  %v425_v14 = vsel %vm424_vm4, %v423_v8, %v422_v5 }
  0xc5   : > { %506 = vrot.lane.b32.xlu1 %v1246_v54, %s2030_s16  ;;  %v461_v9 = vpop.permute.xlu0 %460  ;;  %v514_v10 = vpop.permute.xlu1 %513  ;;  %v428_v15 = vmul.bf16 %v425_v14, %v1661_v28  ;;  %v430_v16 = vmul.bf16 %v425_v14, %v1664_v29 }
  0xc6   : > { %v1251_v11 = vcombine.high %v417_v6, %v419_v7  ;;  %v1250_v18 = vcombine.low %v417_v6, %v419_v7  ;;  %v1255_v19 = vcombine.low %v429_v12, %v431_v13  ;;  %v1477_v6 = vmov 0  }
  0xc7   : > { %1344 = vset.pattern.permute.xlu1 %v1477_v6  ;;  %1345 = vset.pattern.permute.xlu0 %v1477_v6 }
  0xc8   : > { %504 = vrot.lane.b32.xlu0 %v1245_v55, %s2030_s16 }
  0xc9   : > { %482 = vrot.lane.b32.xlu1 %v1242_v57, %s2032_s11  ;;  %v459_v23 = vpop.permute.xlu0 %458  ;;  %v325_v24 = vpop.permute.xlu1 %324 }
  0xca   : > { %v465_v42 = vsel %vm464_vm7, %v459_v23, %v461_v9 }
  0xcc   : > { %502 = vrot.lane.b32.xlu0 %v1244_v60, %s2030_s16 }
  0xcd   : > { %480 = vrot.lane.b32.xlu1 %v1241_v61, %s2032_s11  ;;  %v516_v32 = vpop.permute.xlu0 %515  ;;  %v512_v37 = vpop.permute.xlu1 %511 }
  0xce   : > { %v519_v36 = vsel %vm517_vm6, %v514_v10, %v516_v32 }
  0xd0   : > { %535 = vrot.lane.b32.xlu0 %v1248_v0, %s2022_s18 }
  0xd1   : > { %537 = vrot.lane.b32.xlu1 %v1249_v1, %s2022_s18  ;;  %v1356_v1 = vld [vmem:[%s2015_s1 + $0x4] ss:$8 sps:$4 sm:$0xff]  }
  0xd2   : > { %1258 = vmatprep.mubr.msk.bf16.mxu0 %vm2034_vm13, %v1356_v1  ;;  %vm780_vm13 = vcmask 261120  }
  0xd4   : > { %533 = vrot.lane.b32.xlu0 %v1247_v4, %s2022_s18  ;;  %s2026_s18 = smov 94  }
  0xd5   : > { %568 = vrot.lane.b32.xlu1 %v1658_v27, %s2024_s19  ;;  %v326_v27 = vrot.slane %v325_v24, 4 }
  0xd7   : > { %v332_v33 = vmul.bf16 %v326_v27, %v1649_v25  ;;  %v334_v34 = vmul.bf16 %v326_v27, %v1652_v26  ;;  %v328_v35 = vsel %vm327_vm5, %v326_v27, %v325_v24  ;;  %v518_v25 = vsel %vm517_vm6, %v512_v37, %v514_v10  ;;  %v1787_v10 = vld [vmem:[%s2017_s3] sm:$0xff] }
  0xd8   : > { %566 = vrot.lane.b32.xlu0 %v1671_v30, %s2024_s19  ;;  %v1254_v30 = vcombine.high %v428_v15, %v430_v16  ;;  %v331_v39 = vmul.bf16 %v328_v35, %v1661_v28  ;;  %v333_v40 = vmul.bf16 %v328_v35, %v1664_v29  ;;  %v466_v26 = vsel %vm464_vm7, %v461_v9, %v463_v3 }
  0xd9   : > { %557 = vrot.lane.b32.xlu1 %v1251_v11, %s2028_s15  ;;  %v1237_v38 = vcombine.low %v332_v33, %v334_v34 }
  0xda   : > { %v1236_v41 = vcombine.high %v331_v39, %v333_v40  ;;  %v1235_v43 = vcombine.low %v331_v39, %v333_v40 }
  0xdc   : > { %564 = vrot.lane.b32.xlu0 %v1679_v31, %s2024_s19  ;;  %v1253_v31 = vcombine.low %v428_v15, %v430_v16  ;;  %s1476_s19 = smov 113   ;;  %v274_v15 = vld [vmem:[%s2017_s3 + $0x8] sm:$0xff] }
  0xdd   : > { %555 = vrot.lane.b32.xlu1 %v1250_v18, %s2028_s15  ;;  %v1478_v18 = vmov 1   ;;  %s1479_s15 = smov 32  }
  0xe0   : > { %590 = vrot.lane.b32.xlu0 %v1255_v19, %s2026_s18 }
  0xe1   : > { %588 = vrot.lane.b32.xlu1 %v1254_v30, %s2026_s18 }
  0xe4   : > { %614 = vrot.lane.b32.xlu0 %v463_v3, %s1476_s19 }
  0xe5   : > { %586 = vrot.lane.b32.xlu1 %v1253_v31, %s2026_s18 }
  0xe8   : > { %630 = vrot.lane.b32.xlu0 %v519_v36, %s1476_s19 }
  0xe9   : > { %608 = vrot.lane.b32.xlu1 %v1237_v38, %s1476_s19 }
  0xec   : > { %628 = vrot.lane.b32.xlu0 %v518_v25, %s1476_s19 }
  0xed   : > { %612 = vrot.lane.b32.xlu1 %v466_v26, %s1476_s19 }
  0xf0   : > { %606 = vrot.lane.b32.xlu0 %v1236_v41, %s1476_s19 }
  0xf1   : > { %610 = vrot.lane.b32.xlu1 %v465_v42, %s1476_s19 }
  0xf4   : > { %604 = vrot.lane.b32.xlu0 %v1235_v43, %s1476_s19 }
  0xf5   : > { %632 = vrot.lane.b32.xlu1 %v516_v32, %s1476_s19 }
 0x132   : > { %v485_v29 = vpop.permute.xlu0 %484 }
 0x133   : > { %620 = vrot.lane.b32.xlu1 %v485_v29, %s1476_s19 }
 0x136   : > { %v560_v44 = vpop.permute.xlu0 %559 }
 0x137   : > { %644 = vrot.lane.b32.xlu1 %v560_v44, %s1476_s19  ;;  %v507_v45 = vpop.permute.xlu1 %506 }
 0x138   : > { %626 = vrot.lane.b32.xlu0 %v507_v45, %s1476_s19 }
 0x13a   : > { %v505_v46 = vpop.permute.xlu0 %504 }
 0x13b   : > { %v510_v47 = vsel %vm508_vm8, %v505_v46, %v507_v45  ;;  %v483_v48 = vpop.permute.xlu1 %482 }
 0x13c   : > { %624 = vrot.lane.b32.xlu1 %v510_v47, %s1476_s19  ;;  %v488_v49 = vsel %vm486_vm9, %v483_v48, %v485_v29 }
 0x13d   : > { %618 = vrot.lane.b32.xlu0 %v488_v49, %s1476_s19 }
 0x13e   : > { %v503_v50 = vpop.permute.xlu0 %502 }
 0x13f   : > { %v509_v51 = vsel %vm508_vm8, %v503_v50, %v505_v46  ;;  %v481_v52 = vpop.permute.xlu1 %480 }
 0x140   : > { %622 = vrot.lane.b32.xlu1 %v509_v51, %s1476_s19  ;;  %v487_v53 = vsel %vm486_vm9, %v481_v52, %v483_v48 }
 0x141   : > { %616 = vrot.lane.b32.xlu0 %v487_v53, %s1476_s19 }
 0x142   : > { %v536_v54 = vpop.permute.xlu0 %535 }
 0x143   : > { %v538_v55 = vpop.permute.xlu1 %537 }
 0x144   : > { %v541_v56 = vsel %vm539_vm10, %v536_v54, %v538_v55 }
 0x145   : > { %638 = vrot.lane.b32.xlu0 %v538_v55, %s1476_s19  ;;  %636 = vrot.lane.b32.xlu1 %v541_v56, %s1476_s19 }
 0x146   : > { %v534_v57 = vpop.permute.xlu0 %533 }
 0x147   : > { %v540_v58 = vsel %vm539_vm10, %v534_v57, %v536_v54  ;;  %v569_v59 = vpop.permute.xlu1 %568 }
 0x149   : > { %650 = vrot.lane.b32.xlu0 %v569_v59, %s1476_s19  ;;  %634 = vrot.lane.b32.xlu1 %v540_v58, %s1476_s19 }
 0x14a   : > { %v567_v60 = vpop.permute.xlu0 %566 }
 0x14b   : > { %v572_v61 = vsel %vm570_vm11, %v567_v60, %v569_v59  ;;  %v558_v62 = vpop.permute.xlu1 %557 }
 0x14c   : > { %v563_v63 = vsel %vm561_vm12, %v558_v62, %v560_v44 }
 0x14d   : > { %642 = vrot.lane.b32.xlu0 %v563_v63, %s1476_s19  ;;  %648 = vrot.lane.b32.xlu1 %v572_v61, %s1476_s19 }
 0x14e   : > { %v565_v0 = vpop.permute.xlu0 %564 }
 0x14f   : > { %v571_v2 = vsel %vm570_vm11, %v565_v0, %v567_v60  ;;  %v556_v3 = vpop.permute.xlu1 %555  ;;  %v1354_v0 = vld [vmem:[%s2015_s1] ss:$8 sps:$4 sm:$0xff]  }
 0x150   : > { %v562_v4 = vsel %vm561_vm12, %v556_v3, %v558_v62 }
 0x151   : > { %640 = vrot.lane.b32.xlu0 %v562_v4, %s1476_s19  ;;  %646 = vrot.lane.b32.xlu1 %v571_v2, %s1476_s19 }
 0x152   : > { %v591_v5 = vpop.permute.xlu0 %590 }
 0x153   : > { %v589_v7 = vpop.permute.xlu1 %588 }
 0x154   : > { %v594_v8 = vsel %vm592_vm14, %v589_v7, %v591_v5 }
 0x155   : > { %654 = vrot.lane.b32.xlu0 %v594_v8, %s1476_s19  ;;  %656 = vrot.lane.b32.xlu1 %v591_v5, %s1476_s19 }
 0x156   : > { %v615_v9 = vpop.permute.xlu0 %614 }
 0x157   : > { %v587_v11 = vpop.permute.xlu1 %586 }
 0x158   : > { %v593_v12 = vsel %vm592_vm14, %v587_v11, %v589_v7 }
 0x159   : > { %652 = vrot.lane.b32.xlu0 %v593_v12, %s1476_s19  ;;  %744 = vperm.xlu1 %1344, %v1787_v10  }
 0x15a   : > { %v631_v13 = vpop.permute.xlu0 %630 }
 0x15b   : > { %v609_v14 = vpop.permute.xlu1 %608 }
 0x15d   : > { %1346 = vset.pattern.permute.xlu1 %v1478_v18  ;;  %749 = vperm.xlu0 %1345, %v274_v15  }
 0x15e   : > { %v629_v16 = vpop.permute.xlu0 %628  ;;  %757 = vperm.xlu1 %1346, %v1787_v10  }
 0x15f   : > { %v613_v19 = vpop.permute.xlu1 %612  ;;  %v667_v48 = vsel %vm658_vm15, %v629_v16, %v631_v13 }
 0x160   : > { %v662_v32 = vsel %vm658_vm15, %v613_v19, %v615_v9 }
 0x162   : > { %v607_v23 = vpop.permute.xlu0 %606  ;;  %761 = vperm.xlu1 %1346, %v274_v15  }
 0x163   : > { %v660_v24 = vsel %vm658_vm15, %v607_v23, %v609_v14  ;;  %v611_v30 = vpop.permute.xlu1 %610 }
 0x164   : > { %699 = vmatprep.subr.bf16.mxu0 %v660_v24  ;;  %v661_v34 = vsel %vm658_vm15, %v611_v30, %v613_v19 }
 0x166   : > { %v605_v27 = vpop.permute.xlu0 %604 }
 0x167   : > { %v659_v33 = vsel %vm658_vm15, %v605_v27, %v607_v23  ;;  %v633_v31 = vpop.permute.xlu1 %632 }
 0x168   : > { %700 = vmatpush1.bf16.msra.mxu0 %v659_v33  ;;  %v668_v45 = vsel %vm658_vm15, %v631_v13, %v633_v31 }
 0x169   : > { %701 = vmatprep.subr.bf16.mxu0 %v662_v32 }
 0x16c   : > { %702 = vmatpush1.bf16.msra.mxu0 %v661_v34 }
 0x1a5   : > { %v621_v35 = vpop.permute.xlu1 %620 }
 0x1a9   : > { %v645_v36 = vpop.permute.xlu1 %644 }
 0x1aa   : > { %v627_v37 = vpop.permute.xlu0 %626 }
 0x1ae   : > { %v625_v38 = vpop.permute.xlu1 %624 }
 0x1af   : > { %v619_v39 = vpop.permute.xlu0 %618  ;;  %v666_v42 = vsel %vm658_vm15, %v625_v38, %v627_v37 }
 0x1b0   : > { %v664_v40 = vsel %vm658_vm15, %v619_v39, %v621_v35 }
 0x1b1   : > { %703 = vmatprep.subr.bf16.mxu0 %v664_v40 }
 0x1b2   : > { %v623_v25 = vpop.permute.xlu1 %622 }
 0x1b3   : > { %v617_v26 = vpop.permute.xlu0 %616  ;;  %v665_v44 = vsel %vm658_vm15, %v623_v25, %v625_v38 }
 0x1b4   : > { %v663_v41 = vsel %vm658_vm15, %v617_v26, %v619_v39 }
 0x1b5   : > { %704 = vmatpush1.bf16.msra.mxu0 %v663_v41 }
 0x1b6   : > { %705 = vmatprep.subr.bf16.mxu0 %v666_v42 }
 0x1b7   : > { %v637_v43 = vpop.permute.xlu1 %636  ;;  %v639_v29 = vpop.permute.xlu0 %638 }
 0x1b8   : > { %v670_v49 = vsel %vm658_vm15, %v637_v43, %v639_v29 }
 0x1b9   : > { %706 = vmatpush1.bf16.msra.mxu0 %v665_v44 }
 0x1ba   : > { %707 = vmatprep.subr.bf16.mxu0 %v668_v45 }
 0x1bb   : > { %v635_v46 = vpop.permute.xlu1 %634  ;;  %v651_v47 = vpop.permute.xlu0 %650 }
 0x1bc   : > { %v669_v52 = vsel %vm658_vm15, %v635_v46, %v637_v43 }
 0x1bd   : > { %708 = vmatpush1.bf16.msra.mxu0 %v667_v48 }
 0x1be   : > { %709 = vmatprep.subr.bf16.mxu0 %v670_v49 }
 0x1bf   : > { %v649_v50 = vpop.permute.xlu1 %648  ;;  %v643_v51 = vpop.permute.xlu0 %642 }
 0x1c0   : > { %v672_v53 = vsel %vm658_vm15, %v643_v51, %v645_v36  ;;  %v674_v57 = vsel %vm658_vm15, %v649_v50, %v651_v47 }
 0x1c1   : > { %710 = vmatpush1.bf16.msra.mxu0 %v669_v52 }
 0x1c2   : > { %711 = vmatprep.subr.bf16.mxu0 %v672_v53 }
 0x1c3   : > { %v647_v54 = vpop.permute.xlu1 %646  ;;  %v641_v55 = vpop.permute.xlu0 %640 }
 0x1c4   : > { %v671_v56 = vsel %vm658_vm15, %v641_v55, %v643_v51  ;;  %v673_v60 = vsel %vm658_vm15, %v647_v54, %v649_v50 }
 0x1c5   : > { %712 = vmatpush1.bf16.msra.mxu0 %v671_v56 }
 0x1c6   : > { %713 = vmatprep.subr.bf16.mxu0 %v674_v57 }
 0x1c7   : > { %v657_v58 = vpop.permute.xlu1 %656  ;;  %v655_v59 = vpop.permute.xlu0 %654 }
 0x1c8   : > { %v676_v61 = vsel %vm658_vm15, %v655_v59, %v657_v58 }
 0x1c9   : > { %714 = vmatpush1.bf16.msra.mxu0 %v673_v60 }
 0x1ca   : > { %715 = vmatprep.subr.bf16.mxu0 %v676_v61 }
 0x1cb   : > { %v653_v62 = vpop.permute.xlu0 %652 }
 0x1cc   : > { %v675_v63 = vsel %vm658_vm15, %v653_v62, %v655_v59 }
 0x1cd   : > { %716 = vmatpush1.bf16.msra.mxu0 %v675_v63 }
 0x1d0   : > { %732 = vmatmul.mubr.bf16.vlgmr.msra.gmra.mrb[0].mxu0 %v1354_v0 }
 0x1d8   : > { %v745_v1 = vpop.permute.xlu1 %744 }
 0x1dc   : > { %v750_v4 = vpop.permute.xlu0 %749 }
 0x1dd   : > { %v758_v2 = vpop.permute.xlu1 %757 }
 0x1e1   : > { %v762_v13 = vpop.permute.xlu1 %761 }
 0x2a3   : > { %v733_v3 = vpop.f32.mrb[0].mxu0 }
 0x2a4   : > { %v752_v5 = vmul.f32 %v745_v1, %v733_v3  ;;  %v735_v6 = vpop.f32.mrb[1].mxu0 }
 0x2a5   : > { %v753_v7 = vmul.f32 %v745_v1, %v735_v6  ;;  %v737_v8 = vpop.f32.mrb[2].mxu0 }
 0x2a6   : > { %v764_v9 = vadd.f32 %v758_v2, %v752_v5  ;;  %v754_v11 = vmul.f32 %v750_v4, %v737_v8  ;;  %v739_v12 = vpop.f32.mrb[3].mxu0 }
 0x2a7   : > { %v765_v14 = vadd.f32 %v758_v2, %v753_v7  ;;  %v755_v15 = vmul.f32 %v750_v4, %v739_v12 }
 0x2a8   : > { %v766_v16 = vadd.f32 %v762_v13, %v754_v11  ;;  %v768_v19 = vmax.f32 %v764_v9, 0.0 }
 0x2a9   : > { %v767_v18 = vadd.f32 %v762_v13, %v755_v15  ;;  %v769_v24 = vmax.f32 %v765_v14, 0.0  ;;  %v1480_v14 = vmov 4  }
 0x2aa   : > { %v770_v23 = vmax.f32 %v766_v16, 0.0  ;;  %1347 = vset.pattern.permute.xlu1 %v1480_v14 }
 0x2ab   : > { %v771_v27 = vmax.f32 %v767_v18, 0.0 }
 0x2ac   : > { %v772_v30 = vpack.c.bf16 %v770_v23, %v768_v19  ;;  %v1481_v19 = vmov 5  }
 0x2ad   : > { %v773_v32 = vpack.c.bf16 %v771_v27, %v769_v24  ;;  %1348 = vset.pattern.permute.xlu0 %v1481_v19 }
 0x2ae   : > { %776 = vrot.lane.b32.xlu0 %v772_v30, %s1479_s15 }
 0x2af   : > { %778 = vrot.lane.b32.xlu1 %v773_v32, %s1479_s15 }
 0x2b2   : > { %802 = vrot.lane.b32.xlu0 %v1634_v17, %s1463_s10 }
 0x2b3   : > { %804 = vrot.lane.b32.xlu1 %v1636_v20, %s1463_s10  ;;  %s2040_s10 = smov 112  }
 0x2b6   : > { %813 = vrot.lane.b32.xlu0 %v1638_v21, %s1465_s14 }
 0x2b7   : > { %815 = vrot.lane.b32.xlu1 %v1640_v22, %s1465_s14  ;;  %s2042_s14 = smov 96  }
 0x2ba   : > { %824 = vrot.lane.b32.xlu0 %v1634_v17, %s1462_s7 }
 0x2bb   : > { %826 = vrot.lane.b32.xlu1 %v1636_v20, %s1462_s7  ;;  %s2039_s7 = smov 126  }
 0x2be   : > { %835 = vrot.lane.b32.xlu0 %v1638_v21, %s1464_s12 }
 0x2bf   : > { %837 = vrot.lane.b32.xlu1 %v1640_v22, %s1464_s12  ;;  %s2041_s12 = smov 110  }
 0x2c2   : > { %846 = vrot.lane.b32.xlu0 %v1634_v17, %s1466_s17 }
 0x2c3   : > { %848 = vrot.lane.b32.xlu1 %v1636_v20, %s1466_s17  ;;  %s2043_s17 = smov 95  }
 0x2c6   : > { %791 = vrot.lane.b32.xlu0 %v1638_v21, %s1469_s29 }
 0x2c7   : > { %793 = vrot.lane.b32.xlu1 %v1640_v22, %s1469_s29 }
 0x320   : > { %v777_v33 = vpop.permute.xlu0 %776 }
 0x321   : > { %v1841_v34 = vsel %vm780_vm13, 0, %v777_v33  ;;  %v779_v31 = vpop.permute.xlu1 %778 }
 0x322   : > { %889 = vrot.lane.b32.xlu1 %v1841_v34, %s1468_s26  ;;  %859 = vrot.lane.b32.xlu0 %v1841_v34, %s1467_s20  ;;  %v781_v35 = vsel %vm780_vm13, %v777_v33, %v779_v31  ;;  %v789_v20 = vsel %vm780_vm13, %v779_v31, 0 }
 0x324   : > { %v803_v17 = vpop.permute.xlu0 %802 }
 0x325   : > { %v805_v21 = vpop.permute.xlu1 %804  ;;  %v810_v36 = vmul.bf16 %v803_v17, %v1841_v34 }
 0x326   : > { %863 = vrot.lane.b32.xlu1 %v789_v20, %s1467_s20  ;;  %861 = vrot.lane.b32.xlu0 %v781_v35, %s1467_s20  ;;  %v806_v38 = vsel %vm380_vm1, %v803_v17, %v805_v21  ;;  %v812_v41 = vmul.bf16 %v805_v21, %v789_v20  ;;  %s2044_s20 = smov 94  }
 0x327   : > { %v811_v25 = vmul.bf16 %v806_v38, %v781_v35 }
 0x328   : > { %v814_v22 = vpop.permute.xlu0 %813 }
 0x329   : > { %v821_v37 = vmul.bf16 %v814_v22, %v1841_v34  ;;  %v816_v40 = vpop.permute.xlu1 %815 }
 0x32a   : > { %891 = vrot.lane.b32.xlu1 %v781_v35, %s1468_s26  ;;  %893 = vrot.lane.b32.xlu0 %v789_v20, %s1468_s26  ;;  %v823_v42 = vmul.bf16 %v816_v40, %v789_v20  ;;  %v817_v29 = vsel %vm391_vm0, %v814_v22, %v816_v40  ;;  %vm2045_vm0 = vcmask 130048  }
 0x32b   : > { %v822_v45 = vmul.bf16 %v817_v29, %v781_v35 }
 0x32c   : > { %v825_v39 = vpop.permute.xlu0 %824 }
 0x32d   : > { %v832_v26 = vmul.bf16 %v825_v39, %v1841_v34  ;;  %v827_v43 = vpop.permute.xlu1 %826 }
 0x32e   : > { %870 = vrot.lane.b32.xlu1 %v810_v36, %s2039_s7  ;;  %881 = vrot.lane.b32.xlu0 %v821_v37, %s2040_s10  ;;  %v834_v48 = vmul.bf16 %v827_v43, %v789_v20  ;;  %v828_v49 = vsel %vm402_vm2, %v825_v39, %v827_v43 }
 0x32f   : > { %v833_v51 = vmul.bf16 %v828_v49, %v781_v35  ;;  %v1925_v49 = vld [vmem:[%s2016_s2] sm:$0xff] }
 0x330   : > { %v836_v44 = vpop.permute.xlu0 %835 }
 0x331   : > { %v843_v46 = vmul.bf16 %v836_v44, %v1841_v34  ;;  %v838_v47 = vpop.permute.xlu1 %837 }
 0x332   : > { %872 = vrot.lane.b32.xlu1 %v811_v25, %s2039_s7  ;;  %900 = vrot.lane.b32.xlu0 %v832_v26, %s2041_s12  ;;  %v839_v50 = vsel %vm413_vm3, %v836_v44, %v838_v47  ;;  %v845_v55 = vmul.bf16 %v838_v47, %v789_v20 }
 0x333   : > { %v844_v52 = vmul.bf16 %v839_v50, %v781_v35  ;;  %v1260_v50 = vcombine.high %v1925_v49, %v1925_v49 }
 0x334   : > { %v847_v53 = vpop.permute.xlu0 %846 }
 0x335   : > { %v849_v54 = vpop.permute.xlu1 %848  ;;  %v854_v58 = vmul.bf16 %v847_v53, %v1841_v34  ;;  %1261 = vmatprep.mubr.msk.bf16.mxu1 %vm2045_vm0, %v1260_v50 }
 0x336   : > { %885 = vrot.lane.b32.xlu1 %v823_v42, %s2040_s10  ;;  %874 = vrot.lane.b32.xlu0 %v812_v41, %s2039_s7  ;;  %v850_v56 = vsel %vm424_vm4, %v847_v53, %v849_v54  ;;  %v856_v59 = vmul.bf16 %v849_v54, %v789_v20  ;;  %v1482_v53 = vmov 2   ;;  %v1483_v54 = vmov 3  }
 0x337   : > { %v855_v57 = vmul.bf16 %v850_v56, %v781_v35 }
 0x338   : > { %v792_v60 = vpop.permute.xlu0 %791 }
 0x339   : > { %v794_v61 = vpop.permute.xlu1 %793  ;;  %v799_v62 = vmul.bf16 %v792_v60, %v1841_v34 }
 0x33a   : > { %883 = vrot.lane.b32.xlu0 %v822_v45, %s2040_s10  ;;  %911 = vrot.lane.b32.xlu1 %v843_v46, %s2042_s14  ;;  %v801_v63 = vmul.bf16 %v794_v61, %v789_v20  ;;  %v795_v0 = vsel %vm327_vm5, %v792_v60, %v794_v61  ;;  %s1141_s10 = scalar_lea.sflag [#allocation4], %s1618_s28 }
 0x33b   : > { %v800_v1 = vmul.bf16 %v795_v0, %v781_v35 }
 0x33e   : > { %921 = vrot.lane.b32.xlu0 %v781_v35, %s2043_s17  ;;  %904 = vrot.lane.b32.xlu1 %v834_v48, %s2041_s12 }
 0x342   : > { %902 = vrot.lane.b32.xlu0 %v833_v51, %s2041_s12  ;;  %913 = vrot.lane.b32.xlu1 %v844_v52, %s2042_s14 }
 0x346   : > { %915 = vrot.lane.b32.xlu0 %v845_v55, %s2042_s14  ;;  %923 = vrot.lane.b32.xlu1 %v789_v20, %s2043_s17 }
 0x34a   : > { %919 = vrot.lane.b32.xlu0 %v1841_v34, %s2043_s17  ;;  %932 = vrot.lane.b32.xlu1 %v855_v57, %s2044_s20 }
 0x34e   : > { %934 = vrot.lane.b32.xlu0 %v856_v59, %s2044_s20  ;;  %930 = vrot.lane.b32.xlu1 %v854_v58, %s2044_s20 }
 0x352   : > { %951 = vrot.lane.b32.xlu1 %v801_v63, %s1476_s19  ;;  %947 = vrot.lane.b32.xlu0 %v799_v62, %s1476_s19 }
 0x356   : > { %949 = vrot.lane.b32.xlu0 %v800_v1, %s1476_s19 }
 0x394   : > { %v890_v2 = vpop.permute.xlu1 %889  ;;  %v860_v3 = vpop.permute.xlu0 %859 }
 0x398   : > { %v864_v4 = vpop.permute.xlu1 %863  ;;  %v862_v5 = vpop.permute.xlu0 %861 }
 0x399   : > { %957 = vrot.lane.b32.xlu0 %v864_v4, %s1476_s19  ;;  %v866_v9 = vsel %vm464_vm7, %v862_v5, %v864_v4  ;;  %v865_v15 = vsel %vm464_vm7, %v860_v3, %v862_v5 }
 0x39c   : > { %v892_v6 = vpop.permute.xlu1 %891  ;;  %v894_v7 = vpop.permute.xlu0 %893 }
 0x39d   : > { %v896_v8 = vsel %vm517_vm6, %v892_v6, %v894_v7  ;;  %975 = vrot.lane.b32.xlu1 %v894_v7, %s1476_s19  ;;  %v895_v13 = vsel %vm517_vm6, %v890_v2, %v892_v6 }
 0x39e   : > { %973 = vrot.lane.b32.xlu0 %v896_v8, %s1476_s19 }
 0x3a0   : > { %v871_v11 = vpop.permute.xlu1 %870  ;;  %v882_v12 = vpop.permute.xlu0 %881 }
 0x3a1   : > { %955 = vrot.lane.b32.xlu1 %v866_v9, %s1476_s19 }
 0x3a2   : > { %971 = vrot.lane.b32.xlu0 %v895_v13, %s1476_s19 }
 0x3a4   : > { %v873_v16 = vpop.permute.xlu1 %872  ;;  %v901_v18 = vpop.permute.xlu0 %900 }
 0x3a5   : > { %953 = vrot.lane.b32.xlu1 %v865_v15, %s1476_s19  ;;  %v876_v33 = vsel %vm486_vm9, %v871_v11, %v873_v16 }
 0x3a8   : > { %v886_v23 = vpop.permute.xlu1 %885  ;;  %v875_v24 = vpop.permute.xlu0 %874 }
 0x3a9   : > { %969 = vrot.lane.b32.xlu0 %v886_v23, %s1476_s19  ;;  %963 = vrot.lane.b32.xlu1 %v875_v24, %s1476_s19  ;;  %v877_v27 = vsel %vm486_vm9, %v873_v16, %v875_v24 }
 0x3ac   : > { %v912_v30 = vpop.permute.xlu1 %911  ;;  %v884_v32 = vpop.permute.xlu0 %883 }
 0x3ad   : > { %961 = vrot.lane.b32.xlu0 %v877_v27, %s1476_s19  ;;  %v888_v22 = vsel %vm508_vm8, %v884_v32, %v886_v23  ;;  %v887_v39 = vsel %vm508_vm8, %v882_v12, %v884_v32 }
 0x3b0   : > { %v905_v34 = vpop.permute.xlu1 %904  ;;  %v922_v31 = vpop.permute.xlu0 %921 }
 0x3b1   : > { %959 = vrot.lane.b32.xlu0 %v876_v33, %s1476_s19 }
 0x3b4   : > { %v914_v17 = vpop.permute.xlu1 %913  ;;  %v903_v35 = vpop.permute.xlu0 %902 }
 0x3b5   : > { %981 = vrot.lane.b32.xlu0 %v905_v34, %s1476_s19  ;;  %v917_v40 = vsel %vm561_vm12, %v912_v30, %v914_v17  ;;  %v907_v41 = vsel %vm539_vm10, %v903_v35, %v905_v34  ;;  %v906_v29 = vsel %vm539_vm10, %v901_v18, %v903_v35 }
 0x3b8   : > { %v924_v20 = vpop.permute.xlu1 %923  ;;  %v916_v21 = vpop.permute.xlu0 %915 }
 0x3b9   : > { %993 = vrot.lane.b32.xlu0 %v924_v20, %s1476_s19  ;;  %987 = vrot.lane.b32.xlu1 %v916_v21, %s1476_s19  ;;  %v918_v36 = vsel %vm561_vm12, %v914_v17, %v916_v21  ;;  %v926_v51 = vsel %vm570_vm11, %v922_v31, %v924_v20 }
 0x3bc   : > { %v933_v37 = vpop.permute.xlu1 %932  ;;  %v920_v38 = vpop.permute.xlu0 %919 }
 0x3bd   : > { %985 = vrot.lane.b32.xlu0 %v918_v36, %s1476_s19  ;;  %967 = vrot.lane.b32.xlu1 %v888_v22, %s1476_s19  ;;  %v925_v52 = vsel %vm570_vm11, %v920_v38, %v922_v31  ;;  %v1259_v22 = vcombine.low %v1925_v49, %v1925_v49  ;;  %v1093_v36 = vunpack.c.l.bf16 %v1661_v28  ;;  %v1359_v38 = vld [vmem:[%s1622_s13 + $0x8] sm:$0xf]  ;;  %s1230_s13 = sshll.u32 %s1618_s28, 3 }
 0x3be   : > { %s269_s18 = scalar_lea.vmem [#allocation5], %s1230_s13 }
 0x3bf   : > { %s1155_s11 = sshll.u32 %s269_s18, 4  ;;  %s1972_s11 = int_to_ptr.vmem [resolvable:$true] %s1155_s11 }
 0x3c0   : > { %v935_v25 = vpop.permute.xlu0 %934  ;;  %v931_v26 = vpop.permute.xlu1 %930  ;;  %s1390_s12 = scalar_lea.vmem %s1972_s11, 128 }
 0x3c1   : > { %983 = vrot.lane.b32.xlu0 %v917_v40, %s1476_s19  ;;  %965 = vrot.lane.b32.xlu1 %v887_v39, %s1476_s19  ;;  %v937_v42 = vsel %vm592_vm14, %v933_v37, %v935_v25  ;;  %v936_v44 = vsel %vm592_vm14, %v931_v26, %v933_v37  ;;  %v1094_v37 = vunpack.c.h.bf16 %v1661_v28  ;;  %v1095_v39 = vunpack.c.l.bf16 %v1359_v38  ;;  %p1391_p6 = scmp.ne.s32.totalorder %s1972_s11, %s1390_s12 }
 0x3c3   : > { %p1392_p12 = pnand %p1391_p6, %p2046_p11 }
 0x3c4   : > { %v948_v43 = vpop.permute.xlu0 %947  ;;  %v952_v45 = vpop.permute.xlu1 %951 }
 0x3c5   : > { %979 = vrot.lane.b32.xlu1 %v907_v41, %s1476_s19  ;;  %997 = vrot.lane.b32.xlu0 %v937_v42, %s1476_s19  ;;  %p1393_p13 = pneg %p1392_p12 }
 0x3c8   : > { %v950_v46 = vpop.permute.xlu0 %949 }
 0x3c9   : > { %977 = vrot.lane.b32.xlu1 %v906_v29, %s1476_s19  ;;  %995 = vrot.lane.b32.xlu0 %v936_v44, %s1476_s19  ;;  %v1002_v47 = vsel %vm658_vm15, %v950_v46, %v952_v45  ;;  %v1001_v48 = vsel %vm658_vm15, %v948_v43, %v950_v46 }
 0x3ca   : > { %1040 = vmatprep.subr.bf16.mxu1 %v1002_v47 }
 0x3cb   : > { %1041 = vmatpush1.bf16.msra.mxu1 %v1001_v48 }
 0x3cd   : > { %991 = vrot.lane.b32.xlu1 %v926_v51, %s1476_s19  ;;  %1107 = vperm.xlu0 %1348, %v1787_v10  }
 0x3d1   : > { %989 = vrot.lane.b32.xlu1 %v925_v52, %s1476_s19 }
 0x3d5   : > { %999 = vrot.lane.b32.xlu1 %v935_v25, %s1476_s19  ;;  %s1269_s19 = sshll.u32 %s1541_s25, 7  ;;  %s1484_s25 = smov [#allocation5]  }
 0x3d6   : > { %s1970_s7 = scalar_lea.hbm %s2020_s6, %s1269_s19 }
 0x3d9   : > { %1097 = vperm.xlu1 %1347, %v1787_v10  }
 0x3dd   : > { %1349 = vset.pattern.permute.xlu1 %v1482_v53 }
 0x3de   : > { %1082 = vperm.xlu1 %1349, %v1787_v10  }
 0x3e2   : > { %1350 = vset.pattern.permute.xlu1 %v1483_v54 }
 0x3e3   : > { %1088 = vperm.xlu1 %1350, %v1787_v10  }
 0x40b   : > { %v958_v55 = vpop.permute.xlu0 %957 }
 0x40f   : > { %v976_v56 = vpop.permute.xlu1 %975 }
 0x410   : > { %v974_v57 = vpop.permute.xlu0 %973 }
 0x411   : > { %v1010_v13 = vsel %vm658_vm15, %v974_v57, %v976_v56 }
 0x413   : > { %v956_v58 = vpop.permute.xlu1 %955 }
 0x414   : > { %v1004_v59 = vsel %vm658_vm15, %v956_v58, %v958_v55  ;;  %v972_v60 = vpop.permute.xlu0 %971 }
 0x415   : > { %1042 = vmatprep.subr.bf16.mxu1 %v1004_v59  ;;  %v1009_v15 = vsel %vm658_vm15, %v972_v60, %v974_v57 }
 0x417   : > { %v954_v61 = vpop.permute.xlu1 %953 }
 0x418   : > { %v1003_v62 = vsel %vm658_vm15, %v954_v61, %v956_v58 }
 0x419   : > { %1043 = vmatpush1.bf16.msra.mxu1 %v1003_v62 }
 0x41b   : > { %v970_v63 = vpop.permute.xlu0 %969  ;;  %v964_v0 = vpop.permute.xlu1 %963 }
 0x41f   : > { %v962_v1 = vpop.permute.xlu0 %961 }
 0x420   : > { %v1006_v2 = vsel %vm658_vm15, %v962_v1, %v964_v0 }
 0x421   : > { %1044 = vmatprep.subr.bf16.mxu1 %v1006_v2 }
 0x423   : > { %v960_v3 = vpop.permute.xlu0 %959 }
 0x424   : > { %v1005_v10 = vsel %vm658_vm15, %v960_v3, %v962_v1 }
 0x425   : > { %1045 = vmatpush1.bf16.msra.mxu1 %v1005_v10 }
 0x427   : > { %v982_v4 = vpop.permute.xlu0 %981 }
 0x42b   : > { %v988_v5 = vpop.permute.xlu1 %987  ;;  %v994_v6 = vpop.permute.xlu0 %993 }
 0x42f   : > { %v968_v7 = vpop.permute.xlu1 %967  ;;  %v986_v11 = vpop.permute.xlu0 %985 }
 0x430   : > { %v1008_v8 = vsel %vm658_vm15, %v968_v7, %v970_v63  ;;  %v1014_v24 = vsel %vm658_vm15, %v986_v11, %v988_v5 }
 0x431   : > { %1046 = vmatprep.subr.bf16.mxu1 %v1008_v8 }
 0x433   : > { %v966_v9 = vpop.permute.xlu1 %965  ;;  %v984_v18 = vpop.permute.xlu0 %983 }
 0x434   : > { %v1007_v12 = vsel %vm658_vm15, %v966_v9, %v968_v7  ;;  %v1013_v32 = vsel %vm658_vm15, %v984_v18, %v986_v11 }
 0x435   : > { %1047 = vmatpush1.bf16.msra.mxu1 %v1007_v12 }
 0x436   : > { %1048 = vmatprep.subr.bf16.mxu1 %v1010_v13 }
 0x437   : > { %v980_v14 = vpop.permute.xlu1 %979  ;;  %v998_v30 = vpop.permute.xlu0 %997 }
 0x438   : > { %v1012_v16 = vsel %vm658_vm15, %v980_v14, %v982_v4 }
 0x439   : > { %1049 = vmatpush1.bf16.msra.mxu1 %v1009_v15 }
 0x43a   : > { %1050 = vmatprep.subr.bf16.mxu1 %v1012_v16 }
 0x43b   : > { %v978_v19 = vpop.permute.xlu1 %977  ;;  %v996_v17 = vpop.permute.xlu0 %995 }
 0x43c   : > { %v1011_v23 = vsel %vm658_vm15, %v978_v19, %v980_v14  ;;  %v1017_v21 = vsel %vm658_vm15, %v996_v17, %v998_v30 }
 0x43d   : > { %1051 = vmatpush1.bf16.msra.mxu1 %v1011_v23 }
 0x43e   : > { %1052 = vmatprep.subr.bf16.mxu1 %v1014_v24 }
 0x43f   : > { %v992_v27 = vpop.permute.xlu1 %991 }
 0x440   : > { %v1016_v33 = vsel %vm658_vm15, %v992_v27, %v994_v6 }
 0x441   : > { %1053 = vmatpush1.bf16.msra.mxu1 %v1013_v32 }
 0x442   : > { %1054 = vmatprep.subr.bf16.mxu1 %v1016_v33 }
 0x443   : > { %v990_v34 = vpop.permute.xlu1 %989 }
 0x444   : > { %v1015_v31 = vsel %vm658_vm15, %v990_v34, %v992_v27 }
 0x445   : > { %1055 = vmatpush1.bf16.msra.mxu1 %v1015_v31 }
 0x447   : > { %v1000_v35 = vpop.permute.xlu1 %999 }
 0x448   : > { %v1018_v20 = vsel %vm658_vm15, %v998_v30, %v1000_v35 }
 0x449   : > { %1056 = vmatprep.subr.bf16.mxu1 %v1018_v20 }
 0x44a   : > { %1057 = vmatpush1.bf16.msra.mxu1 %v1017_v21 }
 0x44c   : > { %v1108_v42 = vpop.permute.xlu0 %1107 }
 0x44d   : > { %1073 = vmatmul.mubr.bf16.vlgmr.msra.gmra.mrb[0].mxu1 %v1259_v22 }
 0x458   : > { %v1098_v40 = vpop.permute.xlu1 %1097 }
 0x459   : > { %v1100_v25 = vmul.f32 %v1098_v40, %v1093_v36  ;;  %v1101_v26 = vmul.f32 %v1098_v40, %v1094_v37  ;;  %v1102_v41 = vmul.f32 %v1098_v40, %v1095_v39 }
 0x45b   : > { %v1103_v43 = vmax.f32 %v1100_v25, 0.0  ;;  %v1104_v29 = vmax.f32 %v1101_v26, 0.0  ;;  %v1105_v44 = vmax.f32 %v1102_v41, 0.0 }
 0x45d   : > { %v1110_v45 = vmul.f32 %v1108_v42, %v1103_v43  ;;  %v1111_v46 = vmul.f32 %v1108_v42, %v1104_v29  ;;  %v1112_v47 = vmul.f32 %v1108_v42, %v1105_v44  ;;  %v1083_v28 = vpop.permute.xlu1 %1082 }
 0x45f   : > { %1116 = vrot.lane.b32.xlu0 %v1110_v45, %s2042_s14  ;;  %1118 = vrot.lane.b32.xlu1 %v1111_v46, %s2042_s14 }
 0x462   : > { %v1089_v48 = vpop.permute.xlu1 %1088 }
 0x463   : > { %1120 = vrot.lane.b32.xlu0 %v1112_v47, %s2042_s14  ;;  %s1394_s14 = sshll.u32 %s1484_s25, 4  ;;  %s1395_s14 = int_to_ptr.vmem [resolvable:$false] %s1394_s14 }
 0x464   : > { %s1396_s17 = scalar_lea.vmem %s1395_s14, 256  ;;  %p1397_p8 = scmp.lt.s32.totalorder %s1972_s11, %s1395_s14 }
 0x465   : > { %p1398_p10 = scmp.lt.s32.totalorder %s1396_s17, %s1390_s12 }
 0x467   : > { %p1399_p0 = por %p1398_p10, %p1397_p8 }
 0x469   : > { %p1400_p2 = pnand %p1399_p0, %p1393_p13 }
 0x4d1   : > { %v1117_v49 = vpop.permute.xlu0 %1116  ;;  %v1119_v52 = vpop.permute.xlu1 %1118 }
 0x4d2   : > { %v1123_v59 = vsel %vm561_vm12, %v1117_v49, %v1119_v52 }
 0x4d5   : > { %v1121_v54 = vpop.permute.xlu0 %1120 }
 0x4d6   : > { %v1124_v62 = vsel %vm561_vm12, %v1119_v52, %v1121_v54 }
 0x520   : > { %v1074_v50 = vpop.f32.mrb[0].mxu1 }
 0x521   : > { %v1085_v51 = vmul.f32 %v1083_v28, %v1074_v50  ;;  %v1076_v53 = vpop.f32.mrb[1].mxu1 }
 0x522   : > { %v1086_v55 = vmul.f32 %v1083_v28, %v1076_v53  ;;  %v1078_v56 = vpop.f32.mrb[2].mxu1 }
 0x523   : > { %v1091_v57 = vadd.f32 %v1089_v48, %v1085_v51  ;;  %v1079_v58 = vpop.f32.mrb[3].mxu1 }
 0x524   : > { %v1092_v60 = vadd.f32 %v1089_v48, %v1086_v55 }
 0x525   : > { %v1127_v61 = vadd.f32 %v1123_v59, %v1091_v57 }
 0x526   : > { %v1128_v63 = vadd.f32 %v1124_v62, %v1092_v60 }
 0x527   : > { %v1129_v0 = vmax.f32 %v1127_v61, 0.0 }
 0x528   : > { %v1130_v1 = vmax.f32 %v1128_v63, 0.0 }
 0x52a   : > { %v1268_v2 = vpack.c.bf16 %v1130_v1, %v1129_v0 }
 0x52c   : > { %1139 = vst [vmem:[%s269_s18] sm:$0xff] %v1268_v2 }
 0x52d   : > { %1403 = shalt.err (!%p1400_p2)
}
 0x52e   : > { %s1404_s28 = scalar_lea.hbm %s1970_s7, 128  ;;  %s1408_s29 = scalar_lea.hbm %s2020_s6, 256 }
 0x52f   : > { %p1405_p4 = scmp.ne.s32.totalorder %s1970_s7, %s1404_s28  ;;  %p1409_p9 = scmp.lt.u32.totalorder %s1970_s7, %s2020_s6 }
 0x530   : > { %p1410_p1 = scmp.lt.u32.totalorder %s1408_s29, %s1404_s28  ;;  %p1412_p6 = scmp.lt.u32.totalorder %s1404_s28, %s1970_s7 }
 0x531   : > { %p1406_p5 = pnand %p1405_p4, %p2046_p11 }
 0x532   : > { %p1411_p3 = por %p1410_p1, %p1409_p9 }
 0x533   : > { %p1407_p7 = pneg %p1406_p5 }
 0x534   : > { %p1413_p12 = por %p1412_p6, %p1411_p3 }
 0x536   : > { %p1414_p13 = pnand %p1413_p12, %p1407_p7 }
 0x538   : > { %1417 = shalt.err (!%p1414_p13)
}
 0x539   : > { %1275 = dma.vmem_to_hbm [thread:$0]  (%p2046_p11), %s1972_s11, 128, %s1970_s7, %s1141_s10  }
 0x53a PF: > { %s1167_s18 = sand.u32 1, %s1444_s21   ;;  %p2047_p8 = scmp.ne.s32.totalorder %s2037_s9, 0 }
 0x53b   : > { %p2048_p10 = scmp.ge.s32.totalorder %s1456_s24, 2  ;;  %s1168_s16 = scalar_lea.sflag [#allocation4], %s1167_s18 }
 0x53d   : > { %p1282_p0 = pnand %p2048_p10, %p2047_p8 }
 0x53f   : > { %1439 = dma.done.wait (!%p1282_p0), %s1168_s16, 128  }
 0x540   : > { %1441 = vsyncadd (!%p1282_p0), %s1168_s16, 4294967168  ;;  %p19_p2 = scmp.ge.s32.totalorder %s1545_s27, 4   ;;  %s2049_s21 = smov %s1448_s22 }
 0x541   : > { %s2050_s22 = smov %s1452_s23  ;;  %s2051_s23 = smov %s1557_s30 }
 0x542   : > { %s2052_s24 = smov %s1545_s27  ;;  %21 = sbr.rel (!%p19_p2) target bundleno = 5 (0x5), region = 89 }
 0x549   :  { %1173 = vsyncpa [#allocation3], 1 }
 0x54a   :  { %1175 = vsyncpa [#allocation3 + $0x1], 1 }
 0x54b   :  { %1176 = vsyncpa [#allocation4], 1 }
 0x54c   :  { %1178 = vsyncpa [#allocation4 + $0x1], 1 }

</bundles_post_ra>
